<compile_context>
chip_gen: v7x
topology: tpu7x:2x2x1
jax: 0.10.0
libtpu: 0.0.40
codegen_flags: <defaults>
</compile_context>

<pallas_src>
import jax
import jax.numpy as jnp
from jax.experimental import pallas as pl
from jax.experimental.pallas import tpu as pltpu

LEAKY_SLOPE = 0.01  # nn.LeakyReLU() default negative_slope
LANE = 128
TB_MAX = 2048       # batch tile (rows); multiple of 16 for bf16 sublane packing


def _round_up(n, m):
    return ((n + m - 1) // m) * m


def _cdiv(a, b):
    return (a + b - 1) // b


# ----------------------------------------------------------------------------
# Pallas kernel: fused 3-layer MLP (concat already folded in the wrapper).
# Activations are (rows, features): feature dim -> lanes. Weights are stored
# transposed vs PyTorch, i.e. (in_features, out_features_padded), bf16.
# ----------------------------------------------------------------------------
def _mlp_kernel(x_ref, w1_ref, b1_ref, w2_ref, b2_ref, w3_ref, b3_ref, o_ref):
    # Layer 1: single merged dot over the pre-concatenated [x, g, xtau, a].
    h = jnp.dot(x_ref[...], w1_ref[...],
                preferred_element_type=jnp.float32) + b1_ref[...]
    h = jnp.maximum(h, LEAKY_SLOPE * h)

    # Layer 2.
    h = jnp.dot(h.astype(jnp.bfloat16), w2_ref[...],
                preferred_element_type=jnp.float32) + b2_ref[...]
    h = jnp.maximum(h, LEAKY_SLOPE * h)

    # Output layer: only one real output column, so skip the MXU and use a
    # VPU broadcast-multiply + XLU cross-lane reduction -> (tb, 1).
    out = jnp.sum(h * w3_ref[...], axis=-1, keepdims=True) + b3_ref[...]
    o_ref[...] = out


# ----------------------------------------------------------------------------
# Wrapper: concat + batch tiling + padding + pallas_call
# ----------------------------------------------------------------------------
@jax.jit
def discriminator_fc_forward(kp, x, g, xtau, a):
    B = x.shape[0]
    d_in = x.shape[1] + g.shape[1] + xtau.shape[1] + a.shape[1]
    H1p = kp["w1"].shape[1]
    H2p = kp["w2"].shape[1]

    # Batch tiling: prefer >=2 grid steps (v7x has 2 TensorCores) when the
    # batch allows it; choose the tile from the 16-rounded batch so tail
    # padding never blows up to an extra full tile.
    B16 = _round_up(B, 16)
    num_tiles = max(2, _cdiv(B16, TB_MAX))
    num_tiles = min(num_tiles, max(1, B16 // 16))
    tb = _round_up(_cdiv(B16, num_tiles), 16)
    Bp = num_tiles * tb

    xall = jnp.concatenate([x, g, xtau, a], axis=-1)
    if Bp > B:
        xall = jnp.pad(xall, ((0, Bp - B), (0, 0)))
    xall = xall.astype(jnp.bfloat16)

    def const_spec(shape):
        return pl.BlockSpec(shape, lambda i: (0,) * len(shape))

    flops = 2 * Bp * (d_in * H1p + H1p * H2p + H2p)
    bytes_accessed = (Bp * d_in * 2 + Bp * 4
                      + 2 * (d_in * H1p + H1p * H2p)
                      + 4 * (H1p + 2 * H2p + 1))

    out = pl.pallas_call(
        _mlp_kernel,
        out_shape=jax.ShapeDtypeStruct((Bp, 1), jnp.float32),
        grid=(num_tiles,),
        in_specs=[
            pl.BlockSpec((tb, d_in), lambda i: (i, 0)),
            const_spec(kp["w1"].shape), const_spec(kp["b1"].shape),
            const_spec(kp["w2"].shape), const_spec(kp["b2"].shape),
            const_spec(kp["w3"].shape), const_spec(kp["b3"].shape),
        ],
        out_specs=pl.BlockSpec((tb, 1), lambda i: (i, 0)),
        compiler_params=pltpu.CompilerParams(
            dimension_semantics=("parallel",)),
        cost_estimate=pl.CostEstimate(
            flops=flops, transcendentals=0, bytes_accessed=bytes_accessed),
    )(xall, kp["w1"], kp["b1"], kp["w2"], kp["b2"], kp["w3"], kp["b3"])

    return out[:B]


# ----------------------------------------------------------------------------
# Deterministic parameter construction (mimics nn.Linear init + SpectralNorm)
# ----------------------------------------------------------------------------
def _linear_init(key, in_feat, out_feat):
    """PyTorch nn.Linear default init: U(-1/sqrt(in), 1/sqrt(in))."""
    kw, kb = jax.random.split(key)
    bound = 1.0 / jnp.sqrt(jnp.float32(in_feat))
    W = jax.random.uniform(kw, (out_feat, in_feat), jnp.float32, -bound, bound)
    b = jax.random.uniform(kb, (out_feat,), jnp.float32, -bound, bound)
    return W, b


def _spectral_normalize(W, key, n_iter=1, eps=1e-12):
    """W / sigma(W) via deterministic power iteration (W is (out, in))."""
    out_dim, _ = W.shape
    u = jax.random.normal(key, (out_dim,), jnp.float32)
    u = u / (jnp.linalg.norm(u) + eps)
    v = None
    for _ in range(n_iter):
        v = W.T @ u
        v = v / (jnp.linalg.norm(v) + eps)
        u = W @ v
        u = u / (jnp.linalg.norm(u) + eps)
    sigma = u @ (W @ v)
    return W / sigma


def make_torch_params(key, state_dim, goal_dim, ac_dim, hidden_sizes):
    """Returns [(W, b), ...] in PyTorch layout: W is (out_features, in_features)."""
    input_dim = 2 * state_dim + goal_dim + ac_dim
    dims = [input_dim] + list(hidden_sizes)
    n_hidden = len(hidden_sizes)
    keys = jax.random.split(key, 2 * n_hidden + 1)
    layers = []
    for i in range(n_hidden):
        W, b = _linear_init(keys[2 * i], dims[i], dims[i + 1])
        W = _spectral_normalize(W, keys[2 * i + 1])
        layers.append((W, b))
    W, b = _linear_init(keys[-1], dims[-1], 1)   # out_layer, no spectral norm
    layers.append((W, b))
    return layers


def prepare_kernel_params(layers, lane=LANE):
    """Transpose, zero-pad hidden dims to lane multiples, cast matmul weights to bf16."""
    assert len(layers) == 3, "kernel is fused for exactly 2 hidden layers"
    (W1, b1), (W2, b2), (W3, b3) = layers
    H1, H2 = W1.shape[0], W2.shape[0]
    H1p, H2p = _round_up(H1, lane), _round_up(H2, lane)

    W1t = jnp.pad(W1.T, ((0, 0), (0, H1p - H1)))             # (d_in, H1p)
    b1p = jnp.pad(b1, (0, H1p - H1)).reshape(1, H1p)

    W2t = jnp.pad(W2.T, ((0, H1p - H1), (0, H2p - H2)))      # (H1p, H2p)
    b2p = jnp.pad(b2, (0, H2p - H2)).reshape(1, H2p)

    w3row = jnp.pad(W3.reshape(-1), (0, H2p - H2)).reshape(1, H2p)   # (1, H2p)
    b3p = b3.reshape(1, 1)

    bf, f32 = jnp.bfloat16, jnp.float32
    return dict(
        w1=W1t.astype(bf), b1=b1p.astype(f32),
        w2=W2t.astype(bf), b2=b2p.astype(f32),
        w3=w3row.astype(f32), b3=b3p.astype(f32),
    )


# ----------------------------------------------------------------------------
# Pure-JAX references
# ----------------------------------------------------------------------------
def reference_forward_f32(layers, x, g, xtau, a):
    (W1, b1), (W2, b2), (W3, b3) = layers
    h = jnp.concatenate([x, g, xtau, a], axis=-1)
    h = h @ W1.T + b1
    h = jnp.where(h > 0, h, LEAKY_SLOPE * h)
    h = h @ W2.T + b2
    h = jnp.where(h > 0, h, LEAKY_SLOPE * h)
    return h @ W3.T + b3


def reference_forward_bf16(kp, x, g, xtau, a):
    """Same arithmetic as the kernel (bf16 matmul operands, f32 accumulate)."""
    bf = jnp.bfloat16
    xall = jnp.concatenate([x, g, xtau, a], axis=-1).astype(bf)
    h = jnp.dot(xall, kp["w1"], preferred_element_type=jnp.float32) + kp["b1"]
    h = jnp.maximum(h, LEAKY_SLOPE * h)
    h = jnp.dot(h.astype(bf), kp["w2"], preferred_element_type=jnp.float32) + kp["b2"]
    h = jnp.maximum(h, LEAKY_SLOPE * h)
    return jnp.sum(h * kp["w3"], axis=-1, keepdims=True) + kp["b3"]


if __name__ == "__main__":
    # Small, forward-consistent shapes (input_dim = 2*8 + 4 + 4 = 24).
    state_dim, goal_dim, ac_dim = 8, 4, 4
    hidden_sizes = [64, 64]        # padded to 128 lanes inside prepare_kernel_params
    batch = 8

    root = jax.random.PRNGKey(0)
    k_params, kx, kg, kxt, ka = jax.random.split(root, 5)

    torch_params = make_torch_params(k_params, state_dim, goal_dim, ac_dim, hidden_sizes)
    kp = prepare_kernel_params(torch_params)

    x = jax.random.normal(kx, (batch, state_dim), jnp.float32)
    g = jax.random.normal(kg, (batch, goal_dim), jnp.float32)
    xtau = jax.random.normal(kxt, (batch, state_dim), jnp.float32)
    a = jax.random.normal(ka, (batch, ac_dim), jnp.float32)

    out = jax.block_until_ready(discriminator_fc_forward(kp, x, g, xtau, a))
    assert out.shape == (batch, 1)

    ref_bf16 = reference_forward_bf16(kp, x, g, xtau, a)
    ref_f32 = reference_forward_f32(torch_params, x, g, xtau, a)

    assert jnp.allclose(out, ref_bf16, atol=2e-2, rtol=2e-2), "mismatch vs bf16 reference"
    assert jnp.allclose(out, ref_f32, atol=1e-1, rtol=1e-1), "mismatch vs f32 reference"

    print("KERNEL_OK")
</pallas_src>

<mosaic_0001>
module attributes {stable_mosaic.version = 11 : i64} {
  func.func @_mlp_kernel(%arg0: i32, %arg1: memref<16x24xbf16, #tpu.memory_space<vmem>>, %arg2: memref<24x128xbf16, #tpu.memory_space<vmem>>, %arg3: memref<1x128xf32, #tpu.memory_space<vmem>>, %arg4: memref<128x128xbf16, #tpu.memory_space<vmem>>, %arg5: memref<1x128xf32, #tpu.memory_space<vmem>>, %arg6: memref<1x128xf32, #tpu.memory_space<vmem>>, %arg7: memref<1x1xf32, #tpu.memory_space<vmem>>, %arg8: memref<16x1xf32, #tpu.memory_space<vmem>>) attributes {dimension_semantics = [#tpu.dimension_semantics<parallel>], iteration_bounds = array<i64: 1>, scalar_prefetch = 0 : i64, scratch_operands = 0 : i64, tpu.core_type = #tpu.core_type<tc>, window_params = [{transform_indices = @transform_0, window_bounds = array<i64: 16, 24>}, {pipeline_mode = #tpu.pipeline_mode<synchronous>, transform_indices = @transform_1, window_bounds = array<i64: 24, 128>}, {pipeline_mode = #tpu.pipeline_mode<synchronous>, transform_indices = @transform_2, window_bounds = array<i64: 1, 128>}, {pipeline_mode = #tpu.pipeline_mode<synchronous>, transform_indices = @transform_3, window_bounds = array<i64: 128, 128>}, {pipeline_mode = #tpu.pipeline_mode<synchronous>, transform_indices = @transform_4, window_bounds = array<i64: 1, 128>}, {pipeline_mode = #tpu.pipeline_mode<synchronous>, transform_indices = @transform_5, window_bounds = array<i64: 1, 128>}, {pipeline_mode = #tpu.pipeline_mode<synchronous>, transform_indices = @transform_6, window_bounds = array<i64: 1, 1>}, {transform_indices = @transform_7, window_bounds = array<i64: 16, 1>}]} {
    %c0 = arith.constant 0 : index
    %c0_0 = arith.constant 0 : index
    %0 = vector.load %arg1[%c0, %c0_0] : memref<16x24xbf16, #tpu.memory_space<vmem>>, vector<16x24xbf16>
    %c0_1 = arith.constant 0 : index
    %c0_2 = arith.constant 0 : index
    %1 = vector.load %arg2[%c0_1, %c0_2] : memref<24x128xbf16, #tpu.memory_space<vmem>>, vector<24x128xbf16>
    %cst = arith.constant dense<0.000000e+00> : vector<16x128xf32>
    %2 = tpu.matmul %0, %1, %cst {dimension_numbers = #tpu.dot_dimension_numbers<[1], [0], [0], [1], [0, 0, 1, 1], [], []>} : vector<16x24xbf16>, vector<24x128xbf16>, vector<16x128xf32> -> vector<16x128xf32>
    %c0_3 = arith.constant 0 : index
    %c0_4 = arith.constant 0 : index
    %3 = vector.load %arg3[%c0_3, %c0_4] : memref<1x128xf32, #tpu.memory_space<vmem>>, vector<1x128xf32>
    %4 = vector.broadcast %3 : vector<1x128xf32> to vector<16x128xf32>
    %5 = arith.addf %2, %4 : vector<16x128xf32>
    %cst_5 = arith.constant 0.00999999977 : f32
    %6 = vector.broadcast %cst_5 : f32 to vector<16x128xf32>
    %7 = arith.mulf %6, %5 : vector<16x128xf32>
    %8 = arith.maximumf %5, %7 : vector<16x128xf32>
    %9 = arith.truncf %8 : vector<16x128xf32> to vector<16x128xbf16>
    %c0_6 = arith.constant 0 : index
    %c0_7 = arith.constant 0 : index
    %10 = vector.load %arg4[%c0_6, %c0_7] : memref<128x128xbf16, #tpu.memory_space<vmem>>, vector<128x128xbf16>
    %cst_8 = arith.constant dense<0.000000e+00> : vector<16x128xf32>
    %11 = tpu.matmul %9, %10, %cst_8 {dimension_numbers = #tpu.dot_dimension_numbers<[1], [0], [0], [1], [0, 0, 1, 1], [], []>} : vector<16x128xbf16>, vector<128x128xbf16>, vector<16x128xf32> -> vector<16x128xf32>
    %c0_9 = arith.constant 0 : index
    %c0_10 = arith.constant 0 : index
    %12 = vector.load %arg5[%c0_9, %c0_10] : memref<1x128xf32, #tpu.memory_space<vmem>>, vector<1x128xf32>
    %13 = vector.broadcast %12 : vector<1x128xf32> to vector<16x128xf32>
    %14 = arith.addf %11, %13 : vector<16x128xf32>
    %cst_11 = arith.constant 0.00999999977 : f32
    %15 = vector.broadcast %cst_11 : f32 to vector<16x128xf32>
    %16 = arith.mulf %15, %14 : vector<16x128xf32>
    %17 = arith.maximumf %14, %16 : vector<16x128xf32>
    %c0_12 = arith.constant 0 : index
    %c0_13 = arith.constant 0 : index
    %18 = vector.load %arg6[%c0_12, %c0_13] : memref<1x128xf32, #tpu.memory_space<vmem>>, vector<1x128xf32>
    %19 = vector.broadcast %18 : vector<1x128xf32> to vector<16x128xf32>
    %20 = arith.mulf %17, %19 : vector<16x128xf32>
    %cst_14 = arith.constant dense<0.000000e+00> : vector<16xf32>
    %21 = vector.multi_reduction <add>, %20, %cst_14 [1] : vector<16x128xf32> to vector<16xf32>
    %22 = vector.shape_cast %21 : vector<16xf32> to vector<16x1xf32>
    %c0_15 = arith.constant 0 : index
    %c0_16 = arith.constant 0 : index
    %23 = vector.load %arg7[%c0_15, %c0_16] : memref<1x1xf32, #tpu.memory_space<vmem>>, vector<1x1xf32>
    %24 = vector.broadcast %23 : vector<1x1xf32> to vector<16x1xf32>
    %25 = arith.addf %22, %24 : vector<16x1xf32>
    %c0_17 = arith.constant 0 : index
    %c0_18 = arith.constant 0 : index
    %26 = vector.load %arg8[%c0_17, %c0_18] : memref<16x1xf32, #tpu.memory_space<vmem>>, vector<16x1xf32>
    tpu.vector_store %arg8[%c0_17, %c0_18], %25 {strides = array<i32>} : memref<16x1xf32, #tpu.memory_space<vmem>>, vector<16x1xf32>,
    return
  }
  func.func @transform_0(%arg0: i32) -> (i32, i32) {
    %c0_i32 = arith.constant 0 : i32
    %c0_i32_0 = arith.constant 0 : i32
    return %arg0, %c0_i32 : i32, i32
  }
  func.func @transform_1(%arg0: i32) -> (i32, i32) {
    %c0_i32 = arith.constant 0 : i32
    %c0_i32_0 = arith.constant 0 : i32
    %c0_i32_1 = arith.constant 0 : i32
    return %c0_i32, %c0_i32_0 : i32, i32
  }
  func.func @transform_2(%arg0: i32) -> (i32, i32) {
    %c0_i32 = arith.constant 0 : i32
    %c0_i32_0 = arith.constant 0 : i32
    %c0_i32_1 = arith.constant 0 : i32
    return %c0_i32, %c0_i32_0 : i32, i32
  }
  func.func @transform_3(%arg0: i32) -> (i32, i32) {
    %c0_i32 = arith.constant 0 : i32
    %c0_i32_0 = arith.constant 0 : i32
    %c0_i32_1 = arith.constant 0 : i32
    return %c0_i32, %c0_i32_0 : i32, i32
  }
  func.func @transform_4(%arg0: i32) -> (i32, i32) {
    %c0_i32 = arith.constant 0 : i32
    %c0_i32_0 = arith.constant 0 : i32
    %c0_i32_1 = arith.constant 0 : i32
    return %c0_i32, %c0_i32_0 : i32, i32
  }
  func.func @transform_5(%arg0: i32) -> (i32, i32) {
    %c0_i32 = arith.constant 0 : i32
    %c0_i32_0 = arith.constant 0 : i32
    %c0_i32_1 = arith.constant 0 : i32
    return %c0_i32, %c0_i32_0 : i32, i32
  }
  func.func @transform_6(%arg0: i32) -> (i32, i32) {
    %c0_i32 = arith.constant 0 : i32
    %c0_i32_0 = arith.constant 0 : i32
    %c0_i32_1 = arith.constant 0 : i32
    return %c0_i32, %c0_i32_0 : i32, i32
  }
  func.func @transform_7(%arg0: i32) -> (i32, i32) {
    %c0_i32 = arith.constant 0 : i32
    %c0_i32_0 = arith.constant 0 : i32
    return %arg0, %c0_i32 : i32, i32
  }
}

</mosaic_0001>

<bundles_post_ra>
// kernel: discriminator_fc_forward.1
= control target key start
LH: loop header
LB: loop body
LE: loop exit
PB: predicated region body
PF: predicated region fallthrough
CT: control target
= control target key end

     0   :  { %s464_s0 = inlined_call_operand.vmem [shape: bf16[16,24], index: 0, kind: input, shape index: {}]   ;;  %s465_s1 = inlined_call_operand.vmem [shape: bf16[24,128], index: 1, kind: input, shape index: {}]   ;;  %s466_s2 = inlined_call_operand.vmem [shape: f32[1,128], index: 2, kind: input, shape index: {}]   ;;  %s467_s3 = inlined_call_operand.vmem [shape: bf16[128,128], index: 3, kind: input, shape index: {}]   ;;  %s468_s4 = inlined_call_operand.vmem [shape: f32[1,128], index: 4, kind: input, shape index: {}]   ;;  %s469_s5 = inlined_call_operand.hbm [shape: f32[1,128], index: 5, kind: input, shape index: {}]   ;;  %s470_s6 = inlined_call_operand.<no memory space> [shape: f32[1,1], index: 6, kind: input, shape index: {}]   ;;  %s471_s7 = inlined_call_operand.vmem [shape: f32[16,1], index: 7, kind: output, shape index: {}]  }
   0x1   :  { %v12_v0 = vstv %s470_s6 }
   0x2   :  { %13 = vst [vmem:[#allocation2] sm:$0x1] %v12_v0 }
   0x3   :  { %14 = vsyncpa [#allocation4], 0  ;;  %s361_s26 = smov [#allocation3]   ;;  %s337_s30 = scalar_lea.hbm %s469_s5, 16 }
   0x4   :  { %s31_s27 = sshll.u32 %s361_s26, 4  ;;  %p338_p0 = scmp.ne.s32.totalorder %s469_s5, %s337_s30  ;;  %s32_s27 = int_to_ptr.vmem [resolvable:$true] %s31_s27 }
   0x5   :  { %p341_p1 = scmp.lt.u32.totalorder %s337_s30, %s469_s5 }
   0x7   :  { %p343_p2 = pnand %p341_p1, %p338_p0 }
   0x9   :  { %346 = shalt.err (!%p343_p2)
}
   0xa   :  { %s347_s6 = scalar_lea.vmem %s32_s27, 16  ;;  %s351_s12 = scalar_lea.vmem %s32_s27, 32 }
   0xb   :  { %p348_p3 = scmp.ne.s32.totalorder %s32_s27, %s347_s6  ;;  %p352_p4 = scmp.lt.s32.totalorder %s32_s27, %s32_s27 }
   0xc   :  { %p353_p5 = scmp.lt.s32.totalorder %s351_s12, %s347_s6 }
   0xe   :  { %p354_p6 = por %p353_p5, %p352_p4 }
  0x10   :  { %p355_p7 = pnand %p354_p6, %p348_p3 }
  0x12   :  { %358 = shalt.err (!%p355_p7)
}
  0x13   :  { %34 = dma.hbm_to_vmem [thread:$0]  %s469_s5, 16, %s32_s27, [#allocation4]  }
  0x14   :  { %359 = dma.done.wait [#allocation4], 16  }
  0x15   :  { %360 = vsyncadd [#allocation4], 4294967280  ;;  %v362_v1 = vmov 0.0   ;;  %vm363_vm0 = vmmov 0   ;;  %v326_v2 = vld [vmem:[%s465_s1] sm:$0xff]   ;;  %vm71_vm1 = vcmask 1043456  }
  0x16   :  { %295 = vmatprep.subr.bf16.mxu0 %v362_v1  ;;  %299 = vmatprep.mubr.msk.bf16.mxu0 %vm363_vm0, %v362_v1  ;;  %v327_v3 = vld [vmem:[%s465_s1 + $0x8] ss:$0 sps:$4 sm:$0xff]   ;;  %v329_v5 = vld [vmem:[%s467_s3] sm:$0xff]   ;;  %vm67_vm2 = vcmask 195584   ;;  %v331_v8 = vld [vmem:[%s467_s3 + $0x10] sm:$0xff]   ;;  %vm259_vm3 = vcmask 7168  }
  0x17   :  { %303 = vmatprep.subr.bf16.mxu1 %v362_v1  ;;  %319 = vmatprep.mubr.msk.bf16.mxu1 %vm363_vm0, %v362_v1  ;;  %v73_v4 = vsel %vm71_vm1, %v327_v3, 0  ;;  %v328_v6 = vld [vmem:[%s464_s0] sm:$0xff]   ;;  %v330_v7 = vld [vmem:[%s467_s3 + $0x8] sm:$0xff]   ;;  %v332_v9 = vld [vmem:[%s467_s3 + $0x18] sm:$0xff]  }
  0x18   :  { %296 = vmatpush3.bf16.msra.mxu0 %v326_v2  ;;  %304 = vmatpush3.bf16.msra.mxu1 %v329_v5  ;;  %v333_v10 = vld [vmem:[%s467_s3 + $0x20] sm:$0xff]   ;;  %v334_v11 = vld [vmem:[%s467_s3 + $0x28] sm:$0xff]   ;;  %v335_v12 = vld [vmem:[%s467_s3 + $0x30] sm:$0xff]  }
  0x19   :  { %297 = vmatprep.subr.bf16.mxu0 %v362_v1  ;;  %305 = vmatprep.subr.bf16.mxu1 %v362_v1  ;;  %v336_v13 = vld [vmem:[%s467_s3 + $0x38] sm:$0xff]   ;;  %v267_v14 = vld [vmem:[%s466_s2] ss:$0 sm:$0xff]  ;;  %v281_v34 = vld [vmem:[#allocation3] ss:$0 sm:$0xff] }
  0x1a   :  { %v272_v26 = vld [vmem:[%s468_s4] ss:$0 sm:$0xff] }
  0x1b   :  { %v282_v40 = vld [vmem:[#allocation2] ss:$0 sm:$0xff] }
  0x1c   :  { %298 = vmatpush3.bf16.msra.mxu0 %v73_v4  ;;  %306 = vmatpush3.bf16.msra.mxu1 %v330_v7 }
  0x1d   :  { %307 = vmatprep.subr.bf16.mxu1 %v362_v1 }
  0x1f   :  { %300 = vmatmul.mubr.msk.bf16.vlgmr.msra.gmra.mrb[0].mxu0 %vm67_vm2, %v328_v6 }
  0x20   :  { %308 = vmatpush3.bf16.msra.mxu1 %v331_v8 }
  0x21   :  { %309 = vmatprep.subr.bf16.mxu1 %v362_v1 }
  0x24   :  { %310 = vmatpush3.bf16.msra.mxu1 %v332_v9 }
  0x25   :  { %311 = vmatprep.subr.bf16.mxu1 %v362_v1 }
  0x28   :  { %312 = vmatpush3.bf16.msra.mxu1 %v333_v10 }
  0x29   :  { %313 = vmatprep.subr.bf16.mxu1 %v362_v1 }
  0x2c   :  { %314 = vmatpush3.bf16.msra.mxu1 %v334_v11 }
  0x2d   :  { %315 = vmatprep.subr.bf16.mxu1 %v362_v1 }
  0x30   :  { %316 = vmatpush3.bf16.msra.mxu1 %v335_v12 }
  0x31   :  { %317 = vmatprep.subr.bf16.mxu1 %v362_v1 }
  0x34   :  { %318 = vmatpush3.bf16.msra.mxu1 %v336_v13 }
  0xf2   :  { %v109_v15 = vpop.f32.mrb[0].mxu0 }
  0xf3   :  { %v110_v16 = vadd.f32 %v267_v14, %v109_v15  ;;  %v301_v17 = vpop.f32.mrb[1].mxu0 }
  0xf4   :  { %v112_v18 = vpop.f32.mrb[2].mxu0 }
  0xf5   :  { %v116_v19 = vmul.f32 0.01, %v110_v16  ;;  %v113_v20 = vadd.f32 %v267_v14, %v112_v18  ;;  %v302_v21 = vpop.f32.mrb[3].mxu0 }
  0xf7   :  { %v117_v22 = vmul.f32 0.01, %v113_v20  ;;  %v118_v23 = vmax.f32 %v110_v16, %v116_v19 }
  0xf9   :  { %v119_v24 = vmax.f32 %v113_v20, %v117_v22 }
  0xfb   :  { %v120_v25 = vpack.c.bf16 %v119_v24, %v118_v23 }
  0xfd   :  { %320 = vmatmul.mubr.bf16.vlgmr.msra.gmra.mrb[0].mxu1 %v120_v25 }
 0x1d0   :  { %v226_v27 = vpop.f32.mrb[0].mxu1 }
 0x1d1   :  { %v227_v28 = vadd.f32 %v272_v26, %v226_v27  ;;  %v321_v29 = vpop.f32.mrb[1].mxu1 }
 0x1d2   :  { %v229_v30 = vpop.f32.mrb[2].mxu1 }
 0x1d3   :  { %v233_v31 = vmul.f32 0.01, %v227_v28  ;;  %v230_v32 = vadd.f32 %v272_v26, %v229_v30  ;;  %v322_v33 = vpop.f32.mrb[3].mxu1 }
 0x1d5   :  { %v234_v35 = vmul.f32 0.01, %v230_v32  ;;  %v235_v36 = vmax.f32 %v227_v28, %v233_v31 }
 0x1d7   :  { %v236_v37 = vmax.f32 %v230_v32, %v234_v35  ;;  %v244_v38 = vmul.f32 %v281_v34, %v235_v36 }
 0x1d9   :  { %246 = vadd.xlane.f32.xlu0 %v244_v38  ;;  %v245_v39 = vmul.f32 %v281_v34, %v236_v37 }
 0x1dd   :  { %248 = vadd.xlane.f32.xlu0 %v245_v39 }
 0x266   :  { %v247_v41 = vpop.xlane.xlu0 %246 }
 0x267   :  { %v257_v42 = vadd.f32 %v282_v40, %v247_v41 }
 0x269   :  { %260 = vst.msk [vmem:[%s471_s7] sm:$0xff] %vm259_vm3, %v257_v42 }
 0x26a   :  { %v249_v43 = vpop.xlane.xlu0 %248 }
 0x26b   :  { %v258_v44 = vadd.f32 %v282_v40, %v249_v43 }
 0x26d   :  { %261 = vst.msk [vmem:[%s471_s7 + $0x8] sm:$0xff] %vm259_vm3, %v258_v44 }
 0x26e   :  { %266 = vsyncpa [#allocation4], 1 }

</bundles_post_ra>
